<compile_context>
chip_gen: v6e
topology: v6e:2x2x1
jax: 0.10.0
libtpu: 0.0.40
codegen_flags: <defaults>
</compile_context>

<pallas_src>
import functools

import jax
import jax.numpy as jnp
from jax import lax
from jax.experimental import pallas as pl
from jax.experimental.pallas import tpu as pltpu

# Encoder layer widths (PyTorch nn.Linear out_features): 1 -> 128 -> 64 -> 8.
ENC_DIMS = [(1, 128), (128, 64), (64, 8)]
H1, H2, OUT = 128, 64, 8
LANES = 128

# Packed-parameter layout (all lane-dense, zero padded):
#   p_f32 : (8, 128)  f32   row 0 = first-layer weight row (128,)
#                           row 1 = b0 (128,), row 2 = b1 (64 -> 128 lanes),
#                           row 3 = b2 (8 -> 128 lanes), rows 4..7 zero pad
#   p_w   : (256, 128) bf16  rows [0,128)   = W1^T (128 x 64 -> 128 lanes)
#                            rows [128,256) = W2^T (64 -> 128 rows, 8 -> 128 lanes)
PF_ROWS = 8
PW_ROWS = 2 * H1

# Score-kernel tile sizes.  (512, 1024) keeps the double-buffered output block
# at 4 MiB (+ ~1.5 MiB of embedding blocks): inside v5e's 16 MiB scoped-VMEM
# default, v6e's 32 MiB, and v7x's 64 MiB physical VMEM.  For v5e-only
# deployments (256, 1024) trims writeback pressure further.
TILE_M = 512
TILE_N = 1024


def _encoder_kernel(x_ref, pf_ref, pw_ref, out_ref):
    """x (tile,1) f32 -> embedding (tile,128) f32; lanes >= 8 are exactly 0."""
    x = x_ref[...]                                   # (tile, 1) f32
    w0 = pf_ref[0:1, :]                              # (1, 128) f32
    b0 = pf_ref[1:2, :]
    b1 = pf_ref[2:3, :]
    b2 = pf_ref[3:4, :]

    # Layer 0 (in_features == 1): VPU broadcast multiply-add, all f32.
    h = jnp.maximum(x * w0 + b0, 0.0)                # (tile, 128)

    # Layer 1: 128 -> 64 (padded to 128 lanes). bf16 MXU, f32 accumulate.
    w1 = pw_ref[0:H1, :]                             # (128, 128) bf16
    h = jnp.dot(h.astype(jnp.bfloat16), w1,
                preferred_element_type=jnp.float32) + b1
    h = jnp.maximum(h, 0.0)

    # Layer 2: 64 -> 8 (both padded to 128). bf16 MXU, f32 accumulate, no ReLU.
    w2 = pw_ref[H1:2 * H1, :]                        # (128, 128) bf16
    h = jnp.dot(h.astype(jnp.bfloat16), w2,
                preferred_element_type=jnp.float32) + b2
    out_ref[...] = h                                 # f32 embedding tile


def _score_kernel(a_ref, b_ref, out_ref):
    """One (TM, TN) tile of scores = A @ B^T; f32 MXU (memory-bound here)."""
    s = lax.dot_general(                             # contraction over 128 lanes,
        a_ref[...], b_ref[...],                      # transposed-RHS -> no XLU
        dimension_numbers=(((1,), (1,)), ((), ())),  # transpose on the hot path
        preferred_element_type=jnp.float32)
    out_ref[...] = s.astype(out_ref.dtype)


def _round_up(n, m):
    return ((n + m - 1) // m) * m


def _encode(x, p_f32, p_w, tile):
    """Run one encoder over all rows of x, `tile` rows per grid step."""
    n = x.shape[0]
    n_pad = _round_up(max(n, 1), tile)
    x_pad = jnp.pad(x.astype(jnp.float32), ((0, n_pad - n), (0, 0)))
    return pl.pallas_call(
        _encoder_kernel,
        out_shape=jax.ShapeDtypeStruct((n_pad, LANES), jnp.float32),
        grid_spec=pltpu.PrefetchScalarGridSpec(
            num_scalar_prefetch=0,
            grid=(n_pad // tile,),
            in_specs=[
                pl.BlockSpec((tile, 1), lambda i: (i, 0)),          # x tile
                pl.BlockSpec((PF_ROWS, LANES), lambda i: (0, 0)),   # f32 params (resident)
                pl.BlockSpec((PW_ROWS, LANES), lambda i: (0, 0)),   # bf16 weights (resident)
            ],
            out_specs=pl.BlockSpec((tile, LANES), lambda i: (i, 0)),
        ),
        compiler_params=pltpu.CompilerParams(
            dimension_semantics=("parallel",)),
    )(x_pad, p_f32, p_w)


@functools.partial(jax.jit, static_argnames=("out_dtype",))
def different_rep_critic(v0, v1, pa_packed, pb_packed, out_dtype=jnp.float32):
    """scores[i, j] = <v_A_encoder(v0[i]), v_B_encoder(v1[j])> via Pallas."""
    pa_f32, pa_w = pa_packed
    pb_f32, pb_w = pb_packed
    n0, n1 = v0.shape[0], v1.shape[0]

    tm = min(TILE_M, _round_up(max(n0, 1), 8))       # score rows per tile
    tn = min(TILE_N, _round_up(max(n1, 1), LANES))   # score cols per tile (lane-dense)

    # Encode each side exactly once (hoisted out of the score grid).
    a_emb = _encode(v0, pa_f32, pa_w, tm)            # (n0_pad, 128) f32
    b_emb = _encode(v1, pb_f32, pb_w, tn)            # (n1_pad, 128) f32

    # Pure tiled A @ B^T.  Inputs are padded to exact tile multiples so every
    # read is defined; the output is emitted at exactly (n0, n1) and Pallas
    # clips the partial boundary blocks, so there is no wrapper slice copy.
    # NOTE: pass out_dtype=jnp.bfloat16 to halve HBM writeback if downstream
    # tolerates bf16 scores (the kernel is writeback-bound at scale).
    return pl.pallas_call(
        _score_kernel,
        out_shape=jax.ShapeDtypeStruct((n0, n1), out_dtype),
        grid_spec=pltpu.PrefetchScalarGridSpec(
            num_scalar_prefetch=0,
            grid=(pl.cdiv(n0, tm), pl.cdiv(n1, tn)),
            in_specs=[
                pl.BlockSpec((tm, LANES), lambda i, j: (i, 0)),   # A embeddings
                pl.BlockSpec((tn, LANES), lambda i, j: (j, 0)),   # B embeddings
            ],
            out_specs=pl.BlockSpec((tm, tn), lambda i, j: (i, j)),
        ),
        compiler_params=pltpu.CompilerParams(
            dimension_semantics=("parallel", "parallel")),
    )(a_emb, b_emb)


def pack_encoder_params(params):
    """Pack [(w0,b0),(w1,b1),(w2,b2)] (PyTorch (out,in) weight layout) into
    (p_f32, p_w): a small f32 buffer (first-layer weight row + all biases) and
    a bf16 weight buffer (W1^T | W2^T).  Both lane-dense (.,128); zero padding
    contributes nothing to any contraction.  Done once, outside jit."""
    (w0, b0), (w1, b1), (w2, b2) = params
    p_f32 = jnp.zeros((PF_ROWS, LANES), jnp.float32)
    p_f32 = p_f32.at[0, :H1].set(jnp.asarray(w0, jnp.float32)[:, 0])       # (128,)
    p_f32 = p_f32.at[1, :H1].set(jnp.asarray(b0, jnp.float32))
    p_f32 = p_f32.at[2, :H2].set(jnp.asarray(b1, jnp.float32))
    p_f32 = p_f32.at[3, :OUT].set(jnp.asarray(b2, jnp.float32))

    p_w = jnp.zeros((PW_ROWS, LANES), jnp.float32)
    p_w = p_w.at[0:H1, :H2].set(jnp.asarray(w1, jnp.float32).T)            # (128, 64)
    p_w = p_w.at[H1:H1 + H2, :OUT].set(jnp.asarray(w2, jnp.float32).T)     # (64, 8)
    return p_f32, p_w.astype(jnp.bfloat16)


def _init_linear(key, in_dim, out_dim):
    # PyTorch default nn.Linear init: U(-1/sqrt(fan_in), 1/sqrt(fan_in)).
    kw, kb = jax.random.split(key)
    bound = 1.0 / (in_dim ** 0.5)
    w = jax.random.uniform(kw, (out_dim, in_dim), jnp.float32, -bound, bound)
    b = jax.random.uniform(kb, (out_dim,), jnp.float32, -bound, bound)
    return w, b


def init_params(key):
    keys = jax.random.split(key, 2 * len(ENC_DIMS))
    a = [_init_linear(keys[i], i_d, o_d) for i, (i_d, o_d) in enumerate(ENC_DIMS)]
    b = [_init_linear(keys[len(ENC_DIMS) + i], i_d, o_d)
         for i, (i_d, o_d) in enumerate(ENC_DIMS)]
    return a, b


def _reference(v0, v1, params_a, params_b):
    """Pure-JAX f32 reference of the PyTorch forward pass."""
    def mlp(x, params):
        for i, (w, b) in enumerate(params):
            x = x @ w.T + b
            if i < len(params) - 1:
                x = jnp.maximum(x, 0.0)
        return x
    return mlp(v0, params_a) @ mlp(v1, params_b).T


if __name__ == "__main__":
    key = jax.random.PRNGKey(0)
    kp, k0, k1 = jax.random.split(key, 3)

    params_a, params_b = init_params(kp)
    pa_packed = pack_encoder_params(params_a)     # packed once, outside jit
    pb_packed = pack_encoder_params(params_b)

    # v0, v1: [batch, 1] (both encoders take a single scalar feature).
    v0 = jax.random.normal(k0, (8, 1), dtype=jnp.float32)
    v1 = jax.random.normal(k1, (8, 1), dtype=jnp.float32)

    scores = different_rep_critic(v0, v1, pa_packed, pb_packed)
    scores = jax.block_until_ready(scores)

    ref = _reference(v0, v1, params_a, params_b)
    assert scores.shape == (8, 8), scores.shape
    max_err = float(jnp.max(jnp.abs(scores - ref)))
    # W1/W2 and hidden activations go through bf16 on the MXU (f32 accumulate);
    # embeddings and the score contraction are f32 -> loose tolerance vs f32 ref.
    assert jnp.allclose(scores, ref, atol=5e-2, rtol=5e-2), max_err

    print("KERNEL_OK")
</pallas_src>

<mosaic_0001>
module attributes {stable_mosaic.version = 11 : i64} {
  func.func @_encoder_kernel(%arg0: i32, %arg1: memref<128x1xf32, #tpu.memory_space<vmem>>, %arg2: memref<8x128xf32, #tpu.memory_space<vmem>>, %arg3: memref<256x128xbf16, #tpu.memory_space<vmem>>, %arg4: memref<128x128xf32, #tpu.memory_space<vmem>>) attributes {dimension_semantics = [#tpu.dimension_semantics<parallel>], iteration_bounds = array<i64: 1>, scalar_prefetch = 0 : i64, scratch_operands = 0 : i64, tpu.core_type = #tpu.core_type<tc>, window_params = [{transform_indices = @transform_0, window_bounds = array<i64: 128, 1>}, {pipeline_mode = #tpu.pipeline_mode<synchronous>, transform_indices = @transform_1, window_bounds = array<i64: 8, 128>}, {pipeline_mode = #tpu.pipeline_mode<synchronous>, transform_indices = @transform_2, window_bounds = array<i64: 256, 128>}, {transform_indices = @transform_3, window_bounds = array<i64: 128, 128>}]} {
    %c0 = arith.constant 0 : index
    %c0_0 = arith.constant 0 : index
    %0 = vector.load %arg1[%c0, %c0_0] : memref<128x1xf32, #tpu.memory_space<vmem>>, vector<128x1xf32>
    %c0_1 = arith.constant 0 : index
    %c0_2 = arith.constant 0 : index
    %1 = vector.load %arg2[%c0_1, %c0_2] : memref<8x128xf32, #tpu.memory_space<vmem>>, vector<1x128xf32>
    %c1 = arith.constant 1 : index
    %c0_3 = arith.constant 0 : index
    %2 = vector.load %arg2[%c1, %c0_3] : memref<8x128xf32, #tpu.memory_space<vmem>>, vector<1x128xf32>
    %c2 = arith.constant 2 : index
    %c0_4 = arith.constant 0 : index
    %3 = vector.load %arg2[%c2, %c0_4] : memref<8x128xf32, #tpu.memory_space<vmem>>, vector<1x128xf32>
    %c3 = arith.constant 3 : index
    %c0_5 = arith.constant 0 : index
    %4 = vector.load %arg2[%c3, %c0_5] : memref<8x128xf32, #tpu.memory_space<vmem>>, vector<1x128xf32>
    %5 = vector.broadcast %0 : vector<128x1xf32> to vector<128x128xf32>
    %6 = vector.broadcast %1 : vector<1x128xf32> to vector<128x128xf32>
    %7 = arith.mulf %5, %6 : vector<128x128xf32>
    %8 = vector.broadcast %2 : vector<1x128xf32> to vector<128x128xf32>
    %9 = arith.addf %7, %8 : vector<128x128xf32>
    %cst = arith.constant 0.000000e+00 : f32
    %10 = vector.broadcast %cst : f32 to vector<128x128xf32>
    %11 = arith.maximumf %9, %10 : vector<128x128xf32>
    %c0_6 = arith.constant 0 : index
    %c0_7 = arith.constant 0 : index
    %12 = vector.load %arg3[%c0_6, %c0_7] : memref<256x128xbf16, #tpu.memory_space<vmem>>, vector<128x128xbf16>
    %13 = arith.truncf %11 : vector<128x128xf32> to vector<128x128xbf16>
    %cst_8 = arith.constant dense<0.000000e+00> : vector<128x128xf32>
    %14 = tpu.matmul %13, %12, %cst_8 {dimension_numbers = #tpu.dot_dimension_numbers<[1], [0], [0], [1], [0, 0, 1, 1], [], []>} : vector<128x128xbf16>, vector<128x128xbf16>, vector<128x128xf32> -> vector<128x128xf32>
    %15 = vector.broadcast %3 : vector<1x128xf32> to vector<128x128xf32>
    %16 = arith.addf %14, %15 : vector<128x128xf32>
    %cst_9 = arith.constant 0.000000e+00 : f32
    %17 = vector.broadcast %cst_9 : f32 to vector<128x128xf32>
    %18 = arith.maximumf %16, %17 : vector<128x128xf32>
    %c128 = arith.constant 128 : index
    %c0_10 = arith.constant 0 : index
    %19 = vector.load %arg3[%c128, %c0_10] : memref<256x128xbf16, #tpu.memory_space<vmem>>, vector<128x128xbf16>
    %20 = arith.truncf %18 : vector<128x128xf32> to vector<128x128xbf16>
    %cst_11 = arith.constant dense<0.000000e+00> : vector<128x128xf32>
    %21 = tpu.matmul %20, %19, %cst_11 {dimension_numbers = #tpu.dot_dimension_numbers<[1], [0], [0], [1], [0, 0, 1, 1], [], []>} : vector<128x128xbf16>, vector<128x128xbf16>, vector<128x128xf32> -> vector<128x128xf32>
    %22 = vector.broadcast %4 : vector<1x128xf32> to vector<128x128xf32>
    %23 = arith.addf %21, %22 : vector<128x128xf32>
    %c0_12 = arith.constant 0 : index
    %c0_13 = arith.constant 0 : index
    %24 = vector.load %arg4[%c0_12, %c0_13] : memref<128x128xf32, #tpu.memory_space<vmem>>, vector<128x128xf32>
    tpu.vector_store %arg4[%c0_12, %c0_13], %23 {strides = array<i32>} : memref<128x128xf32, #tpu.memory_space<vmem>>, vector<128x128xf32>,
    return
  }
  func.func @transform_0(%arg0: i32) -> (i32, i32) {
    %c0_i32 = arith.constant 0 : i32
    %c0_i32_0 = arith.constant 0 : i32
    return %arg0, %c0_i32 : i32, i32
  }
  func.func @transform_1(%arg0: i32) -> (i32, i32) {
    %c0_i32 = arith.constant 0 : i32
    %c0_i32_0 = arith.constant 0 : i32
    %c0_i32_1 = arith.constant 0 : i32
    return %c0_i32, %c0_i32_0 : i32, i32
  }
  func.func @transform_2(%arg0: i32) -> (i32, i32) {
    %c0_i32 = arith.constant 0 : i32
    %c0_i32_0 = arith.constant 0 : i32
    %c0_i32_1 = arith.constant 0 : i32
    return %c0_i32, %c0_i32_0 : i32, i32
  }
  func.func @transform_3(%arg0: i32) -> (i32, i32) {
    %c0_i32 = arith.constant 0 : i32
    %c0_i32_0 = arith.constant 0 : i32
    return %arg0, %c0_i32 : i32, i32
  }
}

module attributes {stable_mosaic.version = 11 : i64} {
  func.func @_encoder_kernel(%arg0: i32, %arg1: memref<8x1xf32, #tpu.memory_space<vmem>>, %arg2: memref<8x128xf32, #tpu.memory_space<vmem>>, %arg3: memref<256x128xbf16, #tpu.memory_space<vmem>>, %arg4: memref<8x128xf32, #tpu.memory_space<vmem>>) attributes {dimension_semantics = [#tpu.dimension_semantics<parallel>], iteration_bounds = array<i64: 1>, scalar_prefetch = 0 : i64, scratch_operands = 0 : i64, tpu.core_type = #tpu.core_type<tc>, window_params = [{transform_indices = @transform_0, window_bounds = array<i64: 8, 1>}, {pipeline_mode = #tpu.pipeline_mode<synchronous>, transform_indices = @transform_1, window_bounds = array<i64: 8, 128>}, {pipeline_mode = #tpu.pipeline_mode<synchronous>, transform_indices = @transform_2, window_bounds = array<i64: 256, 128>}, {transform_indices = @transform_3, window_bounds = array<i64: 8, 128>}]} {
    %c0 = arith.constant 0 : index
    %c0_0 = arith.constant 0 : index
    %0 = vector.load %arg1[%c0, %c0_0] : memref<8x1xf32, #tpu.memory_space<vmem>>, vector<8x1xf32>
    %c0_1 = arith.constant 0 : index
    %c0_2 = arith.constant 0 : index
    %1 = vector.load %arg2[%c0_1, %c0_2] : memref<8x128xf32, #tpu.memory_space<vmem>>, vector<1x128xf32>
    %c1 = arith.constant 1 : index
    %c0_3 = arith.constant 0 : index
    %2 = vector.load %arg2[%c1, %c0_3] : memref<8x128xf32, #tpu.memory_space<vmem>>, vector<1x128xf32>
    %c2 = arith.constant 2 : index
    %c0_4 = arith.constant 0 : index
    %3 = vector.load %arg2[%c2, %c0_4] : memref<8x128xf32, #tpu.memory_space<vmem>>, vector<1x128xf32>
    %c3 = arith.constant 3 : index
    %c0_5 = arith.constant 0 : index
    %4 = vector.load %arg2[%c3, %c0_5] : memref<8x128xf32, #tpu.memory_space<vmem>>, vector<1x128xf32>
    %5 = vector.broadcast %0 : vector<8x1xf32> to vector<8x128xf32>
    %6 = vector.broadcast %1 : vector<1x128xf32> to vector<8x128xf32>
    %7 = arith.mulf %5, %6 : vector<8x128xf32>
    %8 = vector.broadcast %2 : vector<1x128xf32> to vector<8x128xf32>
    %9 = arith.addf %7, %8 : vector<8x128xf32>
    %cst = arith.constant 0.000000e+00 : f32
    %10 = vector.broadcast %cst : f32 to vector<8x128xf32>
    %11 = arith.maximumf %9, %10 : vector<8x128xf32>
    %c0_6 = arith.constant 0 : index
    %c0_7 = arith.constant 0 : index
    %12 = vector.load %arg3[%c0_6, %c0_7] : memref<256x128xbf16, #tpu.memory_space<vmem>>, vector<128x128xbf16>
    %13 = arith.truncf %11 : vector<8x128xf32> to vector<8x128xbf16>
    %cst_8 = arith.constant dense<0.000000e+00> : vector<8x128xf32>
    %14 = tpu.matmul %13, %12, %cst_8 {dimension_numbers = #tpu.dot_dimension_numbers<[1], [0], [0], [1], [0, 0, 1, 1], [], []>} : vector<8x128xbf16>, vector<128x128xbf16>, vector<8x128xf32> -> vector<8x128xf32>
    %15 = vector.broadcast %3 : vector<1x128xf32> to vector<8x128xf32>
    %16 = arith.addf %14, %15 : vector<8x128xf32>
    %cst_9 = arith.constant 0.000000e+00 : f32
    %17 = vector.broadcast %cst_9 : f32 to vector<8x128xf32>
    %18 = arith.maximumf %16, %17 : vector<8x128xf32>
    %c128 = arith.constant 128 : index
    %c0_10 = arith.constant 0 : index
    %19 = vector.load %arg3[%c128, %c0_10] : memref<256x128xbf16, #tpu.memory_space<vmem>>, vector<128x128xbf16>
    %20 = arith.truncf %18 : vector<8x128xf32> to vector<8x128xbf16>
    %cst_11 = arith.constant dense<0.000000e+00> : vector<8x128xf32>
    %21 = tpu.matmul %20, %19, %cst_11 {dimension_numbers = #tpu.dot_dimension_numbers<[1], [0], [0], [1], [0, 0, 1, 1], [], []>} : vector<8x128xbf16>, vector<128x128xbf16>, vector<8x128xf32> -> vector<8x128xf32>
    %22 = vector.broadcast %4 : vector<1x128xf32> to vector<8x128xf32>
    %23 = arith.addf %21, %22 : vector<8x128xf32>
    %c0_12 = arith.constant 0 : index
    %c0_13 = arith.constant 0 : index
    %24 = vector.load %arg4[%c0_12, %c0_13] : memref<8x128xf32, #tpu.memory_space<vmem>>, vector<8x128xf32>
    tpu.vector_store %arg4[%c0_12, %c0_13], %23 {strides = array<i32>} : memref<8x128xf32, #tpu.memory_space<vmem>>, vector<8x128xf32>,
    return
  }
  func.func @transform_0(%arg0: i32) -> (i32, i32) {
    %c0_i32 = arith.constant 0 : i32
    %c0_i32_0 = arith.constant 0 : i32
    return %arg0, %c0_i32 : i32, i32
  }
  func.func @transform_1(%arg0: i32) -> (i32, i32) {
    %c0_i32 = arith.constant 0 : i32
    %c0_i32_0 = arith.constant 0 : i32
    %c0_i32_1 = arith.constant 0 : i32
    return %c0_i32, %c0_i32_0 : i32, i32
  }
  func.func @transform_2(%arg0: i32) -> (i32, i32) {
    %c0_i32 = arith.constant 0 : i32
    %c0_i32_0 = arith.constant 0 : i32
    %c0_i32_1 = arith.constant 0 : i32
    return %c0_i32, %c0_i32_0 : i32, i32
  }
  func.func @transform_3(%arg0: i32) -> (i32, i32) {
    %c0_i32 = arith.constant 0 : i32
    %c0_i32_0 = arith.constant 0 : i32
    return %arg0, %c0_i32 : i32, i32
  }
}

module attributes {stable_mosaic.version = 11 : i64} {
  func.func @_score_kernel(%arg0: i32, %arg1: i32, %arg2: memref<8x128xf32, #tpu.memory_space<vmem>>, %arg3: memref<128x128xf32, #tpu.memory_space<vmem>>, %arg4: memref<8x128xf32, #tpu.memory_space<vmem>>) attributes {dimension_semantics = [#tpu.dimension_semantics<parallel>, #tpu.dimension_semantics<parallel>], iteration_bounds = array<i64: 1, 1>, scalar_prefetch = 0 : i64, scratch_operands = 0 : i64, tpu.core_type = #tpu.core_type<tc>, window_params = [{transform_indices = @transform_0, window_bounds = array<i64: 8, 128>}, {transform_indices = @transform_1, window_bounds = array<i64: 128, 128>}, {transform_indices = @transform_2, window_bounds = array<i64: 8, 128>}]} {
    %c0 = arith.constant 0 : index
    %c0_0 = arith.constant 0 : index
    %0 = vector.load %arg2[%c0, %c0_0] : memref<8x128xf32, #tpu.memory_space<vmem>>, vector<8x128xf32>
    %c0_1 = arith.constant 0 : index
    %c0_2 = arith.constant 0 : index
    %1 = vector.load %arg3[%c0_1, %c0_2] : memref<128x128xf32, #tpu.memory_space<vmem>>, vector<128x128xf32>
    %cst = arith.constant dense<0.000000e+00> : vector<8x128xf32>
    %2 = tpu.matmul %0, %1, %cst {dimension_numbers = #tpu.dot_dimension_numbers<[1], [1], [0], [0], [0, 0, 1, 0], [], []>} : vector<8x128xf32>, vector<128x128xf32>, vector<8x128xf32> -> vector<8x128xf32>
    %c0_3 = arith.constant 0 : index
    %c0_4 = arith.constant 0 : index
    %3 = vector.load %arg4[%c0_3, %c0_4] : memref<8x128xf32, #tpu.memory_space<vmem>>, vector<8x128xf32>
    tpu.vector_store %arg4[%c0_3, %c0_4], %2 {strides = array<i32>} : memref<8x128xf32, #tpu.memory_space<vmem>>, vector<8x128xf32>,
    return
  }
  func.func @transform_0(%arg0: i32, %arg1: i32) -> (i32, i32) {
    %c0_i32 = arith.constant 0 : i32
    %c0_i32_0 = arith.constant 0 : i32
    return %arg0, %c0_i32 : i32, i32
  }
  func.func @transform_1(%arg0: i32, %arg1: i32) -> (i32, i32) {
    %c0_i32 = arith.constant 0 : i32
    %c0_i32_0 = arith.constant 0 : i32
    return %arg1, %c0_i32 : i32, i32
  }
  func.func @transform_2(%arg0: i32, %arg1: i32) -> (i32, i32) {
    %c0_i32 = arith.constant 0 : i32
    return %arg0, %arg1 : i32, i32
  }
}

</mosaic_0001>

<bundles_post_ra>
// kernel: different_rep_critic.3
= control target key start
LH: loop header
LB: loop body
LE: loop exit
PB: predicated region body
PF: predicated region fallthrough
CT: control target
= control target key end

     0   :  { %v358_v0 = vmov 0   ;;  %v359_v2 = vmov 0.0   ;;  %vm360_vm0 = vmmov 0   ;;  %s447_s0 = inlined_call_operand.vmem [shape: f32[8,1], index: 0, kind: input, shape index: {}]   ;;  %s448_s2 = inlined_call_operand.vmem [shape: bf16[256,128], index: 2, kind: input, shape index: {}]   ;;  %s449_s1 = inlined_call_operand.vmem [shape: f32[8,128], index: 1, kind: input, shape index: {}]   ;;  %s450_s3 = inlined_call_operand.vmem [shape: f32[8,128], index: 3, kind: output, shape index: {}]  }
   0x1   :  { %341 = vset.pattern.permute.xlu0 %v358_v0  ;;  %v15_v1 = vld [vmem:[%s447_s0] sm:$0xff]  ;;  %298 = vmatprep.subr.bf16.mxu0 %v359_v2  ;;  %v342_v3 = vld [vmem:[%s448_s2 + $0x38] sm:$0xff]   ;;  %v343_v4 = vld [vmem:[%s448_s2 + $0x30] sm:$0xff]  }
   0x2   :  { %22 = vperm.xlu0 %341, %v15_v1   ;;  %318 = vmatprep.subr.bf16.mxu1 %v359_v2  ;;  %v344_v5 = vld [vmem:[%s448_s2 + $0x28] sm:$0xff]   ;;  %v350_v6 = vld [vmem:[%s448_s2 + $0x78] sm:$0xff]   ;;  %v345_v7 = vld [vmem:[%s448_s2 + $0x20] sm:$0xff]  }
   0x3   :  { %299 = vmatpush3.bf16.msra.mxu0 %v342_v3  ;;  %314 = vmatprep.mubr.msk.bf16.mxu0 %vm360_vm0, %v359_v2  ;;  %v351_v8 = vld [vmem:[%s448_s2 + $0x70] sm:$0xff]   ;;  %v346_v9 = vld [vmem:[%s448_s2 + $0x18] sm:$0xff]   ;;  %v352_v10 = vld [vmem:[%s448_s2 + $0x68] sm:$0xff]  }
   0x4   :  { %300 = vmatprep.subr.bf16.mxu0 %v359_v2  ;;  %334 = vmatprep.mubr.msk.bf16.mxu1 %vm360_vm0, %v359_v2  ;;  %v347_v11 = vld [vmem:[%s448_s2 + $0x10] sm:$0xff]   ;;  %v353_v12 = vld [vmem:[%s448_s2 + $0x60] sm:$0xff]   ;;  %v348_v13 = vld [vmem:[%s448_s2 + $0x8] sm:$0xff]  }
   0x5   :  { %319 = vmatpush3.bf16.msra.mxu1 %v350_v6  ;;  %v354_v14 = vld [vmem:[%s448_s2 + $0x58] sm:$0xff]   ;;  %v349_v15 = vld [vmem:[%s448_s2] sm:$0xff]   ;;  %v355_v16 = vld [vmem:[%s448_s2 + $0x50] sm:$0xff]  }
   0x6   :  { %320 = vmatprep.subr.bf16.mxu1 %v359_v2  ;;  %v260_v17 = vld [vmem:[%s449_s1] ss:$0 sm:$0xff]  ;;  %v261_v18 = vld [vmem:[%s449_s1 + $0x1] ss:$0 sm:$0xff]  ;;  %v356_v24 = vld [vmem:[%s448_s2 + $0x48] sm:$0xff]  }
   0x7   :  { %301 = vmatpush3.bf16.msra.mxu0 %v343_v4  ;;  %v357_v25 = vld [vmem:[%s448_s2 + $0x40] sm:$0xff]  }
   0x8   :  { %302 = vmatprep.subr.bf16.mxu0 %v359_v2  ;;  %v262_v26 = vld [vmem:[%s449_s1 + $0x2] ss:$0 sm:$0xff]  ;;  %v271_v34 = vld [vmem:[%s449_s1 + $0x3] ss:$0 sm:$0xff] }
   0x9   :  { %321 = vmatpush3.bf16.msra.mxu1 %v351_v8 }
   0xa   :  { %322 = vmatprep.subr.bf16.mxu1 %v359_v2 }
   0xb   :  { %303 = vmatpush3.bf16.msra.mxu0 %v344_v5 }
   0xc   :  { %304 = vmatprep.subr.bf16.mxu0 %v359_v2 }
   0xd   :  { %323 = vmatpush3.bf16.msra.mxu1 %v352_v10 }
   0xe   :  { %324 = vmatprep.subr.bf16.mxu1 %v359_v2 }
   0xf   :  { %305 = vmatpush3.bf16.msra.mxu0 %v345_v7 }
  0x10   :  { %306 = vmatprep.subr.bf16.mxu0 %v359_v2 }
  0x11   :  { %325 = vmatpush3.bf16.msra.mxu1 %v353_v12 }
  0x12   :  { %326 = vmatprep.subr.bf16.mxu1 %v359_v2 }
  0x13   :  { %307 = vmatpush3.bf16.msra.mxu0 %v346_v9 }
  0x14   :  { %308 = vmatprep.subr.bf16.mxu0 %v359_v2 }
  0x15   :  { %327 = vmatpush3.bf16.msra.mxu1 %v354_v14 }
  0x16   :  { %328 = vmatprep.subr.bf16.mxu1 %v359_v2 }
  0x17   :  { %309 = vmatpush3.bf16.msra.mxu0 %v347_v11 }
  0x18   :  { %310 = vmatprep.subr.bf16.mxu0 %v359_v2 }
  0x19   :  { %329 = vmatpush3.bf16.msra.mxu1 %v355_v16 }
  0x1a   :  { %330 = vmatprep.subr.bf16.mxu1 %v359_v2 }
  0x1b   :  { %311 = vmatpush3.bf16.msra.mxu0 %v348_v13 }
  0x1c   :  { %312 = vmatprep.subr.bf16.mxu0 %v359_v2 }
  0x1d   :  { %331 = vmatpush3.bf16.msra.mxu1 %v356_v24 }
  0x1e   :  { %332 = vmatprep.subr.bf16.mxu1 %v359_v2 }
  0x1f   :  { %313 = vmatpush3.bf16.msra.mxu0 %v349_v15 }
  0x21   :  { %333 = vmatpush3.bf16.msra.mxu1 %v357_v25 }
  0x7d   :  { %v23_v19 = vpop.permute.xlu0 %22 }
  0x7e   :  { %v29_v20 = vmul.f32 %v260_v17, %v23_v19 }
  0x80   :  { %v34_v21 = vadd.f32 %v261_v18, %v29_v20 }
  0x82   :  { %v35_v22 = vmax.f32 %v34_v21, 0.0 }
  0x84   :  { %v52_v23 = vpack.c.bf16 %v35_v22, %v35_v22 }
  0x86   :  { %315 = vmatmul.mubr.bf16.vlgmr.msra.gmra.mxu0 %v52_v23 }
 0x146   :  { %v139_v27 = vpop.f32.mrf.mxu0 }
 0x147   :  { %v140_v28 = vadd.f32 %v262_v26, %v139_v27 }
 0x148   :  { %v316_v29 = vpop.f32.mrf.mxu0 }
 0x149   :  { %v145_v30 = vmax.f32 %v140_v28, 0.0 }
 0x14a   :  { %v142_v31 = vpop.f32.mrf.mxu0 }
 0x14b   :  { %v162_v32 = vpack.c.bf16 %v145_v30, %v145_v30 }
 0x14c   :  { %v317_v33 = vpop.f32.mrf.mxu0 }
 0x14d   :  { %335 = vmatmul.mubr.bf16.vlgmr.msra.gmra.mxu1 %v162_v32 }
 0x20d   :  { %v249_v35 = vpop.f32.mrf.mxu1 }
 0x20e   :  { %v250_v36 = vadd.f32 %v271_v34, %v249_v35 }
 0x20f   :  { %v336_v37 = vpop.f32.mrf.mxu1 }
 0x210   :  { %255 = vst [vmem:[%s450_s3] sm:$0xff] %v250_v36 }
 0x211   :  { %v252_v38 = vpop.f32.mrf.mxu1 }
 0x213   :  { %v337_v39 = vpop.f32.mrf.mxu1 }

// kernel: different_rep_critic.4
= control target key start
LH: loop header
LB: loop body
LE: loop exit
PB: predicated region body
PF: predicated region fallthrough
CT: control target
= control target key end

     0   :  { %v688_v0 = vmov 0   ;;  %s901_s0 = inlined_call_operand.vmem [shape: f32[128,1], index: 0, kind: input, shape index: {}]   ;;  %s902_s2 = inlined_call_operand.vmem [shape: bf16[256,128], index: 2, kind: input, shape index: {}]   ;;  %s903_s1 = inlined_call_operand.vmem [shape: f32[8,128], index: 1, kind: input, shape index: {}]   ;;  %s904_s3 = inlined_call_operand.vmem [shape: f32[128,128], index: 3, kind: output, shape index: {}]  }
   0x1   :  { %671 = vset.pattern.permute.xlu1 %v688_v0  ;;  %670 = vset.pattern.permute.xlu0 %v688_v0  ;;  %v17_v1 = vld [vmem:[%s901_s0 + $0x10] sm:$0xff]  ;;  %v15_v2 = vld [vmem:[%s901_s0] sm:$0xff]  ;;  %v18_v3 = vld [vmem:[%s901_s0 + $0x18] sm:$0xff] }
   0x2   :  { %47 = vperm.xlu1 %671, %v17_v1   ;;  %37 = vperm.xlu0 %670, %v15_v2   ;;  %v16_v4 = vld [vmem:[%s901_s0 + $0x8] sm:$0xff]  ;;  %v19_v6 = vld [vmem:[%s901_s0 + $0x20] sm:$0xff]  ;;  %v672_v7 = vld [vmem:[%s902_s2 + $0x38] sm:$0xff]  }
   0x3   :  { %v20_v5 = vld [vmem:[%s901_s0 + $0x28] sm:$0xff]  ;;  %v673_v8 = vld [vmem:[%s902_s2 + $0x30] sm:$0xff]   ;;  %605 = vmatprep.subr.bf16.mxu0 %v672_v7  ;;  %v22_v9 = vld [vmem:[%s901_s0 + $0x38] sm:$0xff] }
   0x4   :  { %v21_v10 = vld [vmem:[%s901_s0 + $0x30] sm:$0xff]  ;;  %606 = vmatpush3.bf16.msra.mxu0 %v672_v7  ;;  %v674_v11 = vld [vmem:[%s902_s2 + $0x28] sm:$0xff]   ;;  %v23_v13 = vld [vmem:[%s901_s0 + $0x40] sm:$0xff] }
   0x5   :  { %607 = vmatprep.subr.bf16.mxu0 %v673_v8  ;;  %v24_v12 = vld [vmem:[%s901_s0 + $0x48] sm:$0xff]  ;;  %v675_v14 = vld [vmem:[%s902_s2 + $0x20] sm:$0xff]   ;;  %v26_v15 = vld [vmem:[%s901_s0 + $0x58] sm:$0xff] }
   0x6   :  { %52 = vperm.xlu1 %671, %v18_v3   ;;  %42 = vperm.xlu0 %670, %v16_v4   ;;  %v25_v16 = vld [vmem:[%s901_s0 + $0x50] sm:$0xff]  ;;  %v676_v17 = vld [vmem:[%s902_s2 + $0x18] sm:$0xff]   ;;  %v28_v18 = vld [vmem:[%s901_s0 + $0x68] sm:$0xff] }
   0x7   :  { %v27_v19 = vld [vmem:[%s901_s0 + $0x60] sm:$0xff]  ;;  %v677_v20 = vld [vmem:[%s902_s2 + $0x10] sm:$0xff]   ;;  %v30_v21 = vld [vmem:[%s901_s0 + $0x78] sm:$0xff] }
   0x8   :  { %608 = vmatpush3.bf16.msra.mxu0 %v673_v8  ;;  %v29_v22 = vld [vmem:[%s901_s0 + $0x70] sm:$0xff]  ;;  %v678_v23 = vld [vmem:[%s902_s2 + $0x8] sm:$0xff]   ;;  %v679_v24 = vld [vmem:[%s902_s2] sm:$0xff]  }
   0x9   :  { %609 = vmatprep.subr.bf16.mxu0 %v674_v11  ;;  %v680_v25 = vld [vmem:[%s902_s2 + $0x78] sm:$0xff]   ;;  %v681_v26 = vld [vmem:[%s902_s2 + $0x70] sm:$0xff]   ;;  %v682_v27 = vld [vmem:[%s902_s2 + $0x68] sm:$0xff]  }
   0xa   :  { %62 = vperm.xlu1 %671, %v20_v5   ;;  %57 = vperm.xlu0 %670, %v19_v6   ;;  %v683_v28 = vld [vmem:[%s902_s2 + $0x60] sm:$0xff]   ;;  %v684_v29 = vld [vmem:[%s902_s2 + $0x58] sm:$0xff]  }
   0xb   :  { %637 = vmatprep.subr.bf16.mxu1 %v680_v25  ;;  %v799_v30 = vld [vmem:[%s903_s1] ss:$0 sm:$0xff]  ;;  %v804_v33 = vld [vmem:[%s903_s1 + $0x1] ss:$0 sm:$0xff] }
   0xc   :  { %610 = vmatpush3.bf16.msra.mxu0 %v674_v11  ;;  %638 = vmatpush3.bf16.msra.mxu1 %v680_v25 }
   0xd   :  { %611 = vmatprep.subr.bf16.mxu0 %v675_v14  ;;  %639 = vmatprep.subr.bf16.mxu1 %v681_v26 }
   0xe   :  { %72 = vperm.xlu1 %671, %v22_v9   ;;  %67 = vperm.xlu0 %670, %v21_v10  }
  0x10   :  { %612 = vmatpush3.bf16.msra.mxu0 %v675_v14  ;;  %640 = vmatpush3.bf16.msra.mxu1 %v681_v26 }
  0x11   :  { %613 = vmatprep.subr.bf16.mxu0 %v676_v17  ;;  %641 = vmatprep.subr.bf16.mxu1 %v682_v27 }
  0x12   :  { %82 = vperm.xlu1 %671, %v24_v12   ;;  %77 = vperm.xlu0 %670, %v23_v13  }
  0x14   :  { %614 = vmatpush3.bf16.msra.mxu0 %v676_v17  ;;  %642 = vmatpush3.bf16.msra.mxu1 %v682_v27 }
  0x15   :  { %615 = vmatprep.subr.bf16.mxu0 %v677_v20  ;;  %643 = vmatprep.subr.bf16.mxu1 %v683_v28 }
  0x16   :  { %92 = vperm.xlu1 %671, %v26_v15   ;;  %87 = vperm.xlu0 %670, %v25_v16  }
  0x18   :  { %616 = vmatpush3.bf16.msra.mxu0 %v677_v20  ;;  %644 = vmatpush3.bf16.msra.mxu1 %v683_v28 }
  0x19   :  { %617 = vmatprep.subr.bf16.mxu0 %v678_v23  ;;  %645 = vmatprep.subr.bf16.mxu1 %v684_v29 }
  0x1a   :  { %102 = vperm.xlu1 %671, %v28_v18   ;;  %97 = vperm.xlu0 %670, %v27_v19  }
  0x1c   :  { %618 = vmatpush3.bf16.msra.mxu0 %v678_v23  ;;  %646 = vmatpush3.bf16.msra.mxu1 %v684_v29 }
  0x1d   :  { %619 = vmatprep.subr.bf16.mxu0 %v679_v24 }
  0x1e   :  { %112 = vperm.xlu1 %671, %v30_v21   ;;  %107 = vperm.xlu0 %670, %v29_v22  }
  0x20   :  { %620 = vmatpush3.bf16.msra.mxu0 %v679_v24 }
  0x7d   :  { %v48_v31 = vpop.permute.xlu1 %47  ;;  %v38_v32 = vpop.permute.xlu0 %37 }
  0x7e   :  { %v121_v34 = vmul.f32 %v799_v30, %v48_v31  ;;  %v119_v35 = vmul.f32 %v799_v30, %v38_v32 }
  0x80   :  { %v141_v36 = vadd.f32 %v804_v33, %v121_v34  ;;  %v139_v39 = vadd.f32 %v804_v33, %v119_v35 }
  0x81   :  { %v53_v37 = vpop.permute.xlu1 %52  ;;  %v43_v38 = vpop.permute.xlu0 %42 }
  0x82   :  { %v122_v40 = vmul.f32 %v799_v30, %v53_v37  ;;  %v120_v41 = vmul.f32 %v799_v30, %v43_v38  ;;  %v157_v44 = vmax.f32 %v141_v36, 0.0  ;;  %v155_v47 = vmax.f32 %v139_v39, 0.0 }
  0x84   :  { %v142_v42 = vadd.f32 %v804_v33, %v122_v40  ;;  %v140_v43 = vadd.f32 %v804_v33, %v120_v41 }
  0x85   :  { %v63_v45 = vpop.permute.xlu1 %62  ;;  %v58_v46 = vpop.permute.xlu0 %57 }
  0x86   :  { %v158_v48 = vmax.f32 %v142_v42, 0.0  ;;  %v124_v49 = vmul.f32 %v799_v30, %v63_v45  ;;  %v123_v50 = vmul.f32 %v799_v30, %v58_v46  ;;  %v156_v51 = vmax.f32 %v140_v43, 0.0  ;;  %v685_v42 = vld [vmem:[%s902_s2 + $0x50] sm:$0xff]   ;;  %v555_v45 = vld [vmem:[%s903_s1 + $0x2] ss:$0 sm:$0xff] }
  0x87   :  { %647 = vmatprep.subr.bf16.mxu1 %v685_v42 }
  0x88   :  { %v144_v52 = vadd.f32 %v804_v33, %v124_v49  ;;  %v143_v53 = vadd.f32 %v804_v33, %v123_v50  ;;  %v187_v54 = vpack.c.bf16 %v156_v51, %v155_v47  ;;  %v188_v55 = vpack.c.bf16 %v158_v48, %v157_v44  ;;  %648 = vmatpush3.bf16.msra.mxu1 %v685_v42 }
  0x89   :  { %v73_v56 = vpop.permute.xlu1 %72  ;;  %v68_v57 = vpop.permute.xlu0 %67 }
  0x8a   :  { %v160_v58 = vmax.f32 %v144_v52, 0.0  ;;  %v159_v59 = vmax.f32 %v143_v53, 0.0  ;;  %v126_v60 = vmul.f32 %v799_v30, %v73_v56  ;;  %v125_v61 = vmul.f32 %v799_v30, %v68_v57  ;;  %621 = vmatprep.mubr.bf16.mxu0 %v187_v54 }
  0x8b   :  { %622 = vmatmul.mubr.bf16.vlgmr.msra.gmra.mxu0 %v188_v55 }
  0x8c   :  { %v146_v62 = vadd.f32 %v804_v33, %v126_v60  ;;  %v145_v63 = vadd.f32 %v804_v33, %v125_v61  ;;  %v189_v0 = vpack.c.bf16 %v160_v58, %v159_v59 }
  0x8d   :  { %v83_v1 = vpop.permute.xlu1 %82  ;;  %v78_v2 = vpop.permute.xlu0 %77 }
  0x8e   :  { %v162_v3 = vmax.f32 %v146_v62, 0.0  ;;  %v161_v4 = vmax.f32 %v145_v63, 0.0  ;;  %v128_v5 = vmul.f32 %v799_v30, %v83_v1  ;;  %v127_v6 = vmul.f32 %v799_v30, %v78_v2  ;;  %625 = vmatprep.mubr.bf16.mxu0 %v189_v0 }
  0x90   :  { %v148_v7 = vadd.f32 %v804_v33, %v128_v5  ;;  %v147_v8 = vadd.f32 %v804_v33, %v127_v6  ;;  %v190_v9 = vpack.c.bf16 %v162_v3, %v161_v4 }
  0x91   :  { %v93_v10 = vpop.permute.xlu1 %92  ;;  %v88_v11 = vpop.permute.xlu0 %87 }
  0x92   :  { %v164_v12 = vmax.f32 %v148_v7, 0.0  ;;  %v163_v13 = vmax.f32 %v147_v8, 0.0  ;;  %v130_v14 = vmul.f32 %v799_v30, %v93_v10  ;;  %v129_v15 = vmul.f32 %v799_v30, %v88_v11 }
  0x93   :  { %626 = vmatmul.mubr.bf16.gmra.mxu0 %v190_v9 }
  0x94   :  { %v150_v16 = vadd.f32 %v804_v33, %v130_v14  ;;  %v149_v17 = vadd.f32 %v804_v33, %v129_v15  ;;  %v191_v18 = vpack.c.bf16 %v164_v12, %v163_v13 }
  0x95   :  { %v103_v19 = vpop.permute.xlu1 %102  ;;  %v98_v20 = vpop.permute.xlu0 %97 }
  0x96   :  { %v166_v21 = vmax.f32 %v150_v16, 0.0  ;;  %v165_v22 = vmax.f32 %v149_v17, 0.0  ;;  %v132_v23 = vmul.f32 %v799_v30, %v103_v19  ;;  %v131_v24 = vmul.f32 %v799_v30, %v98_v20  ;;  %629 = vmatprep.mubr.bf16.mxu0 %v191_v18 }
  0x98   :  { %v152_v25 = vadd.f32 %v804_v33, %v132_v23  ;;  %v151_v26 = vadd.f32 %v804_v33, %v131_v24  ;;  %v192_v27 = vpack.c.bf16 %v166_v21, %v165_v22 }
  0x99   :  { %v113_v28 = vpop.permute.xlu1 %112  ;;  %v108_v29 = vpop.permute.xlu0 %107 }
  0x9a   :  { %v168_v31 = vmax.f32 %v152_v25, 0.0  ;;  %v167_v32 = vmax.f32 %v151_v26, 0.0  ;;  %v134_v34 = vmul.f32 %v799_v30, %v113_v28  ;;  %v133_v35 = vmul.f32 %v799_v30, %v108_v29  ;;  %v686_v30 = vld [vmem:[%s902_s2 + $0x48] sm:$0xff]  }
  0x9b   :  { %630 = vmatmul.mubr.bf16.gmra.mxu0 %v192_v27  ;;  %649 = vmatprep.subr.bf16.mxu1 %v686_v30 }
  0x9c   :  { %v154_v36 = vadd.f32 %v804_v33, %v134_v34  ;;  %v153_v37 = vadd.f32 %v804_v33, %v133_v35  ;;  %v193_v38 = vpack.c.bf16 %v168_v31, %v167_v32  ;;  %650 = vmatpush3.bf16.msra.mxu1 %v686_v30  ;;  %v687_v33 = vld [vmem:[%s902_s2 + $0x40] sm:$0xff]  }
  0x9d   :  { %651 = vmatprep.subr.bf16.mxu1 %v687_v33 }
  0x9e   :  { %v170_v39 = vmax.f32 %v154_v36, 0.0  ;;  %v169_v40 = vmax.f32 %v153_v37, 0.0  ;;  %633 = vmatprep.mubr.bf16.mxu0 %v193_v38  ;;  %v564_v38 = vld [vmem:[%s903_s1 + $0x3] ss:$0 sm:$0xff] }
  0xa0   :  { %v194_v41 = vpack.c.bf16 %v170_v39, %v169_v40  ;;  %652 = vmatpush3.bf16.msra.mxu1 %v687_v33 }
  0xa3   :  { %634 = vmatmul.mubr.bf16.gmra.mxu0 %v194_v41 }
 0x14b   :  { %v623_v43 = vpop.f32.mrf.mxu0 }
 0x14c   :  { %v290_v49 = vadd.f32 %v623_v43, %v555_v45 }
 0x14d   :  { %v281_v44 = vpop.f32.mrf.mxu0 }
 0x14e   :  { %v282_v47 = vadd.f32 %v555_v45, %v281_v44  ;;  %v346_v56 = vmax.f32 %v290_v49, 0.0 }
 0x14f   :  { %v624_v46 = vpop.f32.mrf.mxu0 }
 0x150   :  { %v293_v48 = vadd.f32 %v624_v46, %v555_v45  ;;  %v344_v54 = vmax.f32 %v282_v47, 0.0 }
 0x151   :  { %v284_v50 = vpop.f32.mrf.mxu0 }
 0x152   :  { %v285_v51 = vadd.f32 %v555_v45, %v284_v50  ;;  %v347_v52 = vmax.f32 %v293_v48, 0.0 }
 0x153   :  { %v627_v53 = vpop.f32.mrf.mxu0 }
 0x154   :  { %v345_v55 = vmax.f32 %v285_v51, 0.0  ;;  %v377_v59 = vpack.c.bf16 %v347_v52, %v346_v56  ;;  %v306_v63 = vadd.f32 %v627_v53, %v555_v45 }
 0x155   :  { %v297_v57 = vpop.f32.mrf.mxu0 }
 0x156   :  { %v376_v58 = vpack.c.bf16 %v345_v55, %v344_v54  ;;  %v298_v61 = vadd.f32 %v555_v45, %v297_v57  ;;  %v350_v6 = vmax.f32 %v306_v63, 0.0 }
 0x157   :  { %v628_v60 = vpop.f32.mrf.mxu0 }
 0x158   :  { %v309_v62 = vadd.f32 %v628_v60, %v555_v45  ;;  %653 = vmatprep.mubr.bf16.mxu1 %v376_v58  ;;  %v348_v4 = vmax.f32 %v298_v61, 0.0 }
 0x159   :  { %v300_v0 = vpop.f32.mrf.mxu0  ;;  %654 = vmatmul.mubr.bf16.vlgmr.msra.gmra.mxu1 %v377_v59 }
 0x15a   :  { %v301_v1 = vadd.f32 %v555_v45, %v300_v0  ;;  %v351_v2 = vmax.f32 %v309_v62, 0.0 }
 0x15b   :  { %v631_v3 = vpop.f32.mrf.mxu0 }
 0x15c   :  { %v349_v5 = vmax.f32 %v301_v1, 0.0  ;;  %v379_v9 = vpack.c.bf16 %v351_v2, %v350_v6  ;;  %v322_v13 = vadd.f32 %v631_v3, %v555_v45 }
 0x15d   :  { %v313_v7 = vpop.f32.mrf.mxu0 }
 0x15e   :  { %v378_v8 = vpack.c.bf16 %v349_v5, %v348_v4  ;;  %v314_v11 = vadd.f32 %v555_v45, %v313_v7  ;;  %v354_v20 = vmax.f32 %v322_v13, 0.0 }
 0x15f   :  { %v632_v10 = vpop.f32.mrf.mxu0 }
 0x160   :  { %v325_v12 = vadd.f32 %v632_v10, %v555_v45  ;;  %657 = vmatprep.mubr.bf16.mxu1 %v378_v8  ;;  %v352_v18 = vmax.f32 %v314_v11, 0.0 }
 0x161   :  { %v316_v14 = vpop.f32.mrf.mxu0  ;;  %658 = vmatmul.mubr.bf16.gmra.mxu1 %v379_v9 }
 0x162   :  { %v317_v15 = vadd.f32 %v555_v45, %v316_v14  ;;  %v355_v16 = vmax.f32 %v325_v12, 0.0 }
 0x163   :  { %v635_v17 = vpop.f32.mrf.mxu0 }
 0x164   :  { %v353_v19 = vmax.f32 %v317_v15, 0.0  ;;  %v381_v23 = vpack.c.bf16 %v355_v16, %v354_v20  ;;  %v338_v27 = vadd.f32 %v635_v17, %v555_v45 }
 0x165   :  { %v329_v21 = vpop.f32.mrf.mxu0 }
 0x166   :  { %v380_v22 = vpack.c.bf16 %v353_v19, %v352_v18  ;;  %v330_v25 = vadd.f32 %v555_v45, %v329_v21  ;;  %v358_v35 = vmax.f32 %v338_v27, 0.0 }
 0x167   :  { %v636_v24 = vpop.f32.mrf.mxu0 }
 0x168   :  { %v341_v26 = vadd.f32 %v636_v24, %v555_v45  ;;  %661 = vmatprep.mubr.bf16.mxu1 %v380_v22  ;;  %v356_v32 = vmax.f32 %v330_v25, 0.0 }
 0x169   :  { %v332_v28 = vpop.f32.mrf.mxu0  ;;  %662 = vmatmul.mubr.bf16.gmra.mxu1 %v381_v23 }
 0x16a   :  { %v333_v29 = vadd.f32 %v555_v45, %v332_v28  ;;  %v359_v31 = vmax.f32 %v341_v26, 0.0 }
 0x16c   :  { %v357_v34 = vmax.f32 %v333_v29, 0.0  ;;  %v383_v37 = vpack.c.bf16 %v359_v31, %v358_v35 }
 0x16e   :  { %v382_v36 = vpack.c.bf16 %v357_v34, %v356_v32 }
 0x170   :  { %665 = vmatprep.mubr.bf16.mxu1 %v382_v36 }
 0x171   :  { %666 = vmatmul.mubr.bf16.gmra.mxu1 %v383_v37 }
 0x219   :  { %v655_v39 = vpop.f32.mrf.mxu1 }
 0x21a   :  { %v479_v40 = vadd.f32 %v655_v39, %v564_v38 }
 0x21b   :  { %v470_v41 = vpop.f32.mrf.mxu1 }
 0x21c   :  { %535 = vst [vmem:[%s904_s3 + $0x10] sm:$0xff] %v479_v40  ;;  %v471_v42 = vadd.f32 %v564_v38, %v470_v41 }
 0x21d   :  { %v656_v30 = vpop.f32.mrf.mxu1 }
 0x21e   :  { %533 = vst [vmem:[%s904_s3] sm:$0xff] %v471_v42  ;;  %v482_v33 = vadd.f32 %v656_v30, %v564_v38 }
 0x21f   :  { %v473_v43 = vpop.f32.mrf.mxu1 }
 0x220   :  { %536 = vst [vmem:[%s904_s3 + $0x18] sm:$0xff] %v482_v33  ;;  %v474_v44 = vadd.f32 %v564_v38, %v473_v43 }
 0x221   :  { %v659_v45 = vpop.f32.mrf.mxu1 }
 0x222   :  { %534 = vst [vmem:[%s904_s3 + $0x8] sm:$0xff] %v474_v44  ;;  %v495_v46 = vadd.f32 %v659_v45, %v564_v38 }
 0x223   :  { %v486_v47 = vpop.f32.mrf.mxu1 }
 0x224   :  { %539 = vst [vmem:[%s904_s3 + $0x30] sm:$0xff] %v495_v46  ;;  %v487_v48 = vadd.f32 %v564_v38, %v486_v47 }
 0x225   :  { %v660_v49 = vpop.f32.mrf.mxu1 }
 0x226   :  { %537 = vst [vmem:[%s904_s3 + $0x20] sm:$0xff] %v487_v48  ;;  %v498_v50 = vadd.f32 %v660_v49, %v564_v38 }
 0x227   :  { %v489_v51 = vpop.f32.mrf.mxu1 }
 0x228   :  { %540 = vst [vmem:[%s904_s3 + $0x38] sm:$0xff] %v498_v50  ;;  %v490_v52 = vadd.f32 %v564_v38, %v489_v51 }
 0x229   :  { %v663_v53 = vpop.f32.mrf.mxu1 }
 0x22a   :  { %538 = vst [vmem:[%s904_s3 + $0x28] sm:$0xff] %v490_v52  ;;  %v511_v54 = vadd.f32 %v663_v53, %v564_v38 }
 0x22b   :  { %v502_v55 = vpop.f32.mrf.mxu1 }
 0x22c   :  { %543 = vst [vmem:[%s904_s3 + $0x50] sm:$0xff] %v511_v54  ;;  %v503_v56 = vadd.f32 %v564_v38, %v502_v55 }
 0x22d   :  { %v664_v57 = vpop.f32.mrf.mxu1 }
 0x22e   :  { %541 = vst [vmem:[%s904_s3 + $0x40] sm:$0xff] %v503_v56  ;;  %v514_v58 = vadd.f32 %v664_v57, %v564_v38 }
 0x22f   :  { %v505_v59 = vpop.f32.mrf.mxu1 }
 0x230   :  { %544 = vst [vmem:[%s904_s3 + $0x58] sm:$0xff] %v514_v58  ;;  %v506_v60 = vadd.f32 %v564_v38, %v505_v59 }
 0x231   :  { %v667_v61 = vpop.f32.mrf.mxu1 }
 0x232   :  { %542 = vst [vmem:[%s904_s3 + $0x48] sm:$0xff] %v506_v60  ;;  %v527_v62 = vadd.f32 %v667_v61, %v564_v38 }
 0x233   :  { %v518_v63 = vpop.f32.mrf.mxu1 }
 0x234   :  { %547 = vst [vmem:[%s904_s3 + $0x70] sm:$0xff] %v527_v62  ;;  %v519_v0 = vadd.f32 %v564_v38, %v518_v63 }
 0x235   :  { %v668_v1 = vpop.f32.mrf.mxu1 }
 0x236   :  { %545 = vst [vmem:[%s904_s3 + $0x60] sm:$0xff] %v519_v0  ;;  %v530_v2 = vadd.f32 %v668_v1, %v564_v38 }
 0x237   :  { %v521_v3 = vpop.f32.mrf.mxu1 }
 0x238   :  { %548 = vst [vmem:[%s904_s3 + $0x78] sm:$0xff] %v530_v2  ;;  %v522_v4 = vadd.f32 %v564_v38, %v521_v3 }
 0x23a   :  { %546 = vst [vmem:[%s904_s3 + $0x68] sm:$0xff] %v522_v4 }

// kernel: different_rep_critic.5
= control target key start
LH: loop header
LB: loop body
LE: loop exit
PB: predicated region body
PF: predicated region fallthrough
CT: control target
= control target key end

     0   :  { %v191_v1 = vmov 0.0   ;;  %vm192_vm0 = vmmov 0   ;;  %s263_s0 = inlined_call_operand.vmem [shape: f32[8,128], index: 0, kind: input, shape index: {}]   ;;  %s264_s1 = inlined_call_operand.vmem [shape: f32[128,128], index: 1, kind: input, shape index: {}]   ;;  %s265_s2 = inlined_call_operand.hbm [shape: f32[8,8], index: 2, kind: output, shape index: {}]  }
   0x1   :  { %v28_v0 = vld [vmem:[%s264_s1 + $0x78] sm:$0xff]  ;;  %131 = vmatprep.subr.mxu0 %v191_v1  ;;  %163 = vmatprep.mubr.msk.f32.mxu0 %vm192_vm0, %v191_v1  ;;  %v27_v2 = vld [vmem:[%s264_s1 + $0x70] sm:$0xff] }
   0x2   :  { %132 = vmatpush3.xpose.msra.mxu0 %v28_v0 }
   0x3   :  { %133 = vmatprep.subr.mxu0 %v191_v1 }
   0x4   :  { %7 = vsyncpa [#allocation3], 0  ;;  %v26_v3 = vld [vmem:[%s264_s1 + $0x68] sm:$0xff]  ;;  %v25_v4 = vld [vmem:[%s264_s1 + $0x60] sm:$0xff]  ;;  %s193_s15 = smov [#allocation2]  }
   0x5   :  { %v24_v5 = vld [vmem:[%s264_s1 + $0x58] sm:$0xff]  ;;  %v23_v6 = vld [vmem:[%s264_s1 + $0x50] sm:$0xff]  ;;  %v22_v7 = vld [vmem:[%s264_s1 + $0x48] sm:$0xff]  ;;  %s106_s16 = sshll.u32 %s193_s15, 4  ;;  %s107_s16 = int_to_ptr.vmem [resolvable:$true] %s106_s16 }
   0x6   :  { %134 = vmatpush3.xpose.msra.mxu0 %v27_v2  ;;  %v21_v8 = vld [vmem:[%s264_s1 + $0x40] sm:$0xff]  ;;  %v20_v9 = vld [vmem:[%s264_s1 + $0x38] sm:$0xff]  ;;  %v19_v10 = vld [vmem:[%s264_s1 + $0x30] sm:$0xff]  ;;  %s169_s17 = scalar_lea.vmem %s107_s16, 128  ;;  %p174_p1 = scmp.lt.s32.totalorder %s107_s16, %s107_s16 }
   0x7   :  { %135 = vmatprep.subr.mxu0 %v191_v1  ;;  %v18_v11 = vld [vmem:[%s264_s1 + $0x28] sm:$0xff]  ;;  %v17_v12 = vld [vmem:[%s264_s1 + $0x20] sm:$0xff]  ;;  %v16_v13 = vld [vmem:[%s264_s1 + $0x18] sm:$0xff]  ;;  %p170_p0 = scmp.ne.s32.totalorder %s107_s16, %s169_s17  ;;  %p175_p2 = scmp.lt.s32.totalorder %s169_s17, %s169_s17 }
   0x8   :  { %v15_v14 = vld [vmem:[%s264_s1 + $0x10] sm:$0xff]  ;;  %v14_v15 = vld [vmem:[%s264_s1 + $0x8] sm:$0xff]  ;;  %v13_v16 = vld [vmem:[%s264_s1] sm:$0xff] }
   0x9   :  { %v12_v17 = vld [vmem:[%s263_s0] sm:$0xff]  ;;  %p176_p3 = por %p175_p2, %p174_p1 }
   0xa   :  { %136 = vmatpush3.xpose.msra.mxu0 %v26_v3 }
   0xb   :  { %137 = vmatprep.subr.mxu0 %v191_v1  ;;  %p177_p4 = pnand %p176_p3, %p170_p0 }
   0xe   :  { %138 = vmatpush3.xpose.msra.mxu0 %v25_v4 }
   0xf   :  { %139 = vmatprep.subr.mxu0 %v191_v1 }
  0x12   :  { %140 = vmatpush3.xpose.msra.mxu0 %v24_v5 }
  0x13   :  { %141 = vmatprep.subr.mxu0 %v191_v1 }
  0x16   :  { %142 = vmatpush3.xpose.msra.mxu0 %v23_v6 }
  0x17   :  { %143 = vmatprep.subr.mxu0 %v191_v1 }
  0x1a   :  { %144 = vmatpush3.xpose.msra.mxu0 %v22_v7 }
  0x1b   :  { %145 = vmatprep.subr.mxu0 %v191_v1 }
  0x1e   :  { %146 = vmatpush3.xpose.msra.mxu0 %v21_v8 }
  0x1f   :  { %147 = vmatprep.subr.mxu0 %v191_v1 }
  0x22   :  { %148 = vmatpush3.xpose.msra.mxu0 %v20_v9 }
  0x23   :  { %149 = vmatprep.subr.mxu0 %v191_v1 }
  0x26   :  { %150 = vmatpush3.xpose.msra.mxu0 %v19_v10 }
  0x27   :  { %151 = vmatprep.subr.mxu0 %v191_v1 }
  0x2a   :  { %152 = vmatpush3.xpose.msra.mxu0 %v18_v11 }
  0x2b   :  { %153 = vmatprep.subr.mxu0 %v191_v1 }
  0x2e   :  { %154 = vmatpush3.xpose.msra.mxu0 %v17_v12 }
  0x2f   :  { %155 = vmatprep.subr.mxu0 %v191_v1 }
  0x32   :  { %156 = vmatpush3.xpose.msra.mxu0 %v16_v13 }
  0x33   :  { %157 = vmatprep.subr.mxu0 %v191_v1 }
  0x36   :  { %158 = vmatpush3.xpose.msra.mxu0 %v15_v14 }
  0x37   :  { %159 = vmatprep.subr.mxu0 %v191_v1 }
  0x3a   :  { %160 = vmatpush3.xpose.msra.mxu0 %v14_v15 }
  0x3b   :  { %161 = vmatprep.subr.mxu0 %v191_v1 }
  0x3e   :  { %162 = vmatpush3.xpose.msra.mxu0 %v13_v16 }
  0x41   :  { %164 = vmatmul.mubr.f32.vlgmr.msra.gmra.mxu0 %v12_v17 }
 0x101   :  { %v95_v18 = vpop.f32.mrf.mxu0 }
 0x102   :  { %99 = vst [vmem:[#allocation2] sm:$0xff] %v95_v18 }
 0x103   :  { %v165_v19 = vpop.f32.mrf.mxu0 }
 0x104   :  { %180 = shalt.err (!%p177_p4)
}
 0x105   :  { %109 = dma.vmem_to_hbm [thread:$0]  %s107_s16, 128, %s265_s2, [#allocation3]  }
 0x106   :  { %189 = dma.done.wait [#allocation3], 128  }
 0x107   :  { %190 = vsyncadd [#allocation3], 4294967168 }
 0x108   :  { %113 = vsyncpa [#allocation3], 1 }

</bundles_post_ra>
